<compile_context>
chip_gen: v7x
topology: tpu7x:2x2x1
jax: 0.10.0
libtpu: 0.0.40
codegen_flags: <defaults>
</compile_context>

<pallas_src>
import jax
import jax.numpy as jnp
import numpy as np
from jax.experimental import pallas as pl
from jax.experimental.pallas import tpu as pltpu

_CHUNK_THRESHOLD_BYTES = 1 << 20   # only chunk the DMA for arrays >= 1 MiB
_MAX_DMA_CHUNKS = 4                # a few DMAs in flight is plenty for HBM->HBM


def _make_copy_kernel(chunks, full_copy):
    """Build a kernel that DMA-copies x_ref -> o_ref entirely in HBM."""

    def kernel(x_ref, o_ref, sem):
        if full_copy:
            cp = pltpu.make_async_copy(x_ref, o_ref, sem.at[0])
            cp.start()
            cp.wait()
        else:
            copies = []
            for c, (start, stop) in enumerate(chunks):   # static Python chunks
                cp = pltpu.make_async_copy(
                    x_ref.at[start:stop], o_ref.at[start:stop], sem.at[c]
                )
                cp.start()
                copies.append(cp)
            for cp in copies:
                cp.wait()

    return kernel


def _pallas_copy(x: jax.Array) -> jax.Array:
    """Materialize a bit-exact copy of x via an HBM->HBM DMA Pallas kernel."""
    orig_shape = x.shape
    if x.ndim == 0:
        x = x.reshape(1)

    dim0 = x.shape[0]
    nbytes = x.size * jnp.dtype(x.dtype).itemsize

    if nbytes >= _CHUNK_THRESHOLD_BYTES and dim0 >= 2:
        n_chunks = min(_MAX_DMA_CHUNKS, dim0)
    else:
        n_chunks = 1

    # Balanced static chunk boundaries along the (contiguous) leading axis.
    bounds = [round(i * dim0 / n_chunks) for i in range(n_chunks + 1)]
    chunks = tuple(
        (bounds[i], bounds[i + 1])
        for i in range(n_chunks)
        if bounds[i + 1] > bounds[i]
    )
    full_copy = len(chunks) == 1

    out = pl.pallas_call(
        _make_copy_kernel(chunks, full_copy),
        out_shape=jax.ShapeDtypeStruct(x.shape, x.dtype),
        in_specs=[pl.BlockSpec(memory_space=pl.ANY)],     # raw HBM ref, no auto-DMA
        out_specs=pl.BlockSpec(memory_space=pl.ANY),      # raw HBM ref, no auto-DMA
        scratch_shapes=[pltpu.SemaphoreType.DMA((len(chunks),))],
    )(x)
    return out.reshape(orig_shape)


def identity(x: jax.Array, *, use_pallas: bool = False) -> jax.Array:
    """Identity.forward(x) -> x.

    Default path is the true zero-cost identity (no kernel launch, no HBM
    traffic).  `use_pallas=True` routes through the Pallas HBM->HBM DMA copy
    kernel, for when an explicitly materialized copy is required.
    """
    if not use_pallas or x.size == 0:
        return x
    return _pallas_copy(x)


if __name__ == "__main__":
    key = jax.random.PRNGKey(0)

    # (1) Typical small NCHW feature map -> single-DMA path.
    x1 = jax.random.normal(key, (2, 4, 16, 16), dtype=jnp.float32)
    # (2) Ragged, non-multiple-of-128 shape -> still a single DMA, no pad/slice.
    x2 = jax.random.normal(key, (3, 5, 7), dtype=jnp.bfloat16)
    # (3) 1 MiB input -> chunked multi-DMA path (several DMAs in flight).
    x3 = jax.random.normal(key, (8, 256, 128), dtype=jnp.float32)

    ok = True
    for x in (x1, x2, x3):
        x_host = np.asarray(jax.device_get(x))

        # Default (true) identity: no kernel, returns x.
        y_fast = identity(x)
        jax.block_until_ready(y_fast)
        ok &= y_fast.shape == x_host.shape and y_fast.dtype == x_host.dtype
        ok &= np.array_equal(np.asarray(jax.device_get(y_fast)), x_host)

        # Pallas HBM->HBM DMA copy path.
        y_pallas = identity(x, use_pallas=True)
        jax.block_until_ready(y_pallas)
        ok &= y_pallas.shape == x_host.shape and y_pallas.dtype == x_host.dtype
        ok &= np.array_equal(np.asarray(jax.device_get(y_pallas)), x_host)

    assert ok, "identity mismatch"
    print("KERNEL_OK")
</pallas_src>

<mosaic_0001>
module attributes {stable_mosaic.version = 11 : i64} {
  func.func @kernel(%arg0: memref<2x4x16x16xf32, #tpu.memory_space<any>>, %arg1: memref<2x4x16x16xf32, #tpu.memory_space<any>>, %arg2: memref<1x!tpu.dma_semaphore, #tpu.memory_space<semaphore_mem>>) attributes {dimension_semantics = [], scalar_prefetch = 0 : i64, scratch_operands = 1 : i64, tpu.core_type = #tpu.core_type<tc>} {
    %c0_i32 = arith.constant 0 : i32
    %0 = tpu.memref_slice %arg2[%c0_i32] : memref<1x!tpu.dma_semaphore, #tpu.memory_space<semaphore_mem>> -> memref<1x!tpu.dma_semaphore, #tpu.memory_space<semaphore_mem>>
    %1 = tpu.memref_squeeze %0 : memref<1x!tpu.dma_semaphore, #tpu.memory_space<semaphore_mem>> -> memref<!tpu.dma_semaphore, #tpu.memory_space<semaphore_mem>>
    tpu.enqueue_dma source(%arg0 : memref<2x4x16x16xf32, #tpu.memory_space<any>>) target(%arg1 : memref<2x4x16x16xf32, #tpu.memory_space<any>>) target_semaphore(%1 : memref<!tpu.dma_semaphore, #tpu.memory_space<semaphore_mem>>)
    %c0_i32_0 = arith.constant 0 : i32
    %2 = tpu.memref_slice %arg2[%c0_i32_0] : memref<1x!tpu.dma_semaphore, #tpu.memory_space<semaphore_mem>> -> memref<1x!tpu.dma_semaphore, #tpu.memory_space<semaphore_mem>>
    %3 = tpu.memref_squeeze %2 : memref<1x!tpu.dma_semaphore, #tpu.memory_space<semaphore_mem>> -> memref<!tpu.dma_semaphore, #tpu.memory_space<semaphore_mem>>
    tpu.wait_dma2 semaphore(%3 : memref<!tpu.dma_semaphore, #tpu.memory_space<semaphore_mem>>) src(%arg0 : memref<2x4x16x16xf32, #tpu.memory_space<any>>) dst(%arg1 : memref<2x4x16x16xf32, #tpu.memory_space<any>>)
    return
  }
}

</mosaic_0001>

<bundles_post_ra>
// kernel: tpu_custom_call.1
= control target key start
LH: loop header
LB: loop body
LE: loop exit
PB: predicated region body
PF: predicated region fallthrough
CT: control target
= control target key end

     0   :  { %s36_s6 = smov [#allocation2]   ;;  %s37_s7 = smov [#allocation3]   ;;  %s55_s0 = inlined_call_operand.hbm [shape: f32[2,4,16,16], index: 0, kind: input, shape index: {}]   ;;  %s56_s1 = inlined_call_operand.hbm [shape: f32[2,4,16,16], index: 1, kind: output, shape index: {}]  }
   0x1   :  { %s38_s8 = smov 0  }
   0x2   :  { %18 = dma.general %s55_s0, 2048, %s56_s1, %s36_s6, %s37_s7, [#allocation4], %s38_s8, 0  }
   0x3   :  { %34 = dma.done.wait [#allocation2], 2048 }
   0x4   :  { %35 = vsyncadd [#allocation2], 4294965248 }
   0x5   :  { %24 = vsyncmov [#allocation2] }
   0x8   :  { %s25_s13 = vpop.sfrf %24 }
   0x9   :  { %p30_p0 = scmp.ne.s32.totalorder %s25_s13, 0 }
   0xb   :  { %29 = shalt.err (%p30_p0)  }

</bundles_post_ra>
